<compile_context>
chip_gen: v7x
topology: tpu7x:2x2x1
jax: 0.10.0
libtpu: 0.0.40
codegen_flags: <defaults>
</compile_context>

<pallas_src>
import functools

import jax
import jax.numpy as jnp
from jax.experimental import pallas as pl
from jax.experimental.pallas import tpu as pltpu

LANE = 128
SUBLANE = 8

HID1 = 128   # fc1 output features (already lane-dense)
HID2 = 64    # fc2 output features (padded to 128 inside the wrapper)

NEG_BIG = -1.0e30  # padded-logit bias; never wins argmax


def _round_up(n, m):
    return ((n + m - 1) // m) * m


def _elu(x):
    # ELU(alpha=1): x if x > 0 else exp(x) - 1
    return jnp.where(x > 0, x, jnp.exp(x) - 1.0)


def uanet_kernel(x_ref, w1_ref, b1_ref, w2_ref, b2_ref, w3_ref, b3_ref,
                 g_ref, out_ref):
    x = x_ref[...]  # (TILE_B, D_in_pad) bf16

    # fc1 + ELU  (dropout p=0.2 is identity in eval mode)
    h1 = jnp.dot(x, w1_ref[...], preferred_element_type=jnp.float32) + b1_ref[...]
    h1 = _elu(h1)

    # fc2 + ELU  (padded hidden-2 columns: 0 @ x + 0 bias -> ELU(0) = 0)
    h2 = jnp.dot(h1.astype(jnp.bfloat16), w2_ref[...],
                 preferred_element_type=jnp.float32) + b2_ref[...]
    h2 = _elu(h2)

    # fc3 -> logits (padded output columns forced to ~-inf via padded bias)
    logits = jnp.dot(h2.astype(jnp.bfloat16), w3_ref[...],
                     preferred_element_type=jnp.float32) + b3_ref[...]

    # gumbel_softmax(hard=True), tau=1, dim=-1.
    # Forward value = one_hot(argmax(logits + g)); softmax is monotone so the
    # explicit softmax is skipped. Ties -> first index (matches torch argmax).
    z = logits + g_ref[...]
    tb, k = z.shape
    col = jax.lax.broadcasted_iota(jnp.int32, (tb, k), 1)
    zmax = jnp.max(z, axis=-1, keepdims=True)
    idx = jnp.min(jnp.where(z == zmax, col, k), axis=-1, keepdims=True)
    out_ref[...] = (col == idx).astype(out_ref.dtype)


@functools.partial(jax.jit, static_argnames=("tile_b",))
def user_association_net_usl(x, params, gumbel_noise, *, tile_b=1024):
    """x: (B, D_in) f32; params: dict of (fan_in, fan_out) weights and (1, fan_out)
    biases; gumbel_noise: (B, D_out) f32. Returns (B, D_out) one-hot f32."""
    B, d_in = x.shape
    d_out = params["w3"].shape[1]

    # ---- lane/sublane padding (zero-pad; padded logits get -1e30 bias) ----
    d_in_p = _round_up(d_in, LANE)
    h2_p = _round_up(HID2, LANE)
    d_out_p = _round_up(d_out, LANE)
    tile_b = min(tile_b, _round_up(B, SUBLANE))
    b_p = _round_up(B, tile_b)

    def pad2(a, rows, cols, fill=0.0):
        return jnp.pad(a, ((0, rows - a.shape[0]), (0, cols - a.shape[1])),
                       constant_values=fill)

    x_p = pad2(x, b_p, d_in_p).astype(jnp.bfloat16)
    g_p = pad2(gumbel_noise, b_p, d_out_p).astype(jnp.float32)

    w1 = pad2(params["w1"], d_in_p, HID1).astype(jnp.bfloat16)
    b1 = pad2(params["b1"], 1, HID1).astype(jnp.float32)
    w2 = pad2(params["w2"], HID1, h2_p).astype(jnp.bfloat16)
    b2 = pad2(params["b2"], 1, h2_p).astype(jnp.float32)
    w3 = pad2(params["w3"], h2_p, d_out_p).astype(jnp.bfloat16)
    # padded output classes must never win the argmax
    b3 = pad2(params["b3"], 1, d_out_p, fill=NEG_BIG).astype(jnp.float32)

    grid = (b_p // tile_b,)
    const = lambda i: (0, 0)   # weights/biases resident across all batch tiles
    batch = lambda i: (i, 0)

    out_p = pl.pallas_call(
        uanet_kernel,
        out_shape=jax.ShapeDtypeStruct((b_p, d_out_p), jnp.float32),
        grid_spec=pltpu.PrefetchScalarGridSpec(
            num_scalar_prefetch=0,
            grid=grid,
            in_specs=[
                pl.BlockSpec((tile_b, d_in_p), batch),   # x
                pl.BlockSpec((d_in_p, HID1), const),     # w1
                pl.BlockSpec((1, HID1), const),          # b1
                pl.BlockSpec((HID1, h2_p), const),       # w2
                pl.BlockSpec((1, h2_p), const),          # b2
                pl.BlockSpec((h2_p, d_out_p), const),    # w3
                pl.BlockSpec((1, d_out_p), const),       # b3
                pl.BlockSpec((tile_b, d_out_p), batch),  # gumbel noise
            ],
            out_specs=pl.BlockSpec((tile_b, d_out_p), batch),
        ),
        compiler_params=pltpu.CompilerParams(
            dimension_semantics=("parallel",),
        ),
    )(x_p, w1, b1, w2, b2, w3, b3, g_p)

    return out_p[:B, :d_out]


def init_params(key, input_dims, output_dims):
    """Deterministic synthetic init mimicking nn.Linear default (uniform
    +-1/sqrt(fan_in)); weights stored transposed as (fan_in, fan_out)."""
    def linear(k, fan_in, fan_out):
        kw, kb = jax.random.split(k)
        bound = 1.0 / jnp.sqrt(fan_in)
        w = jax.random.uniform(kw, (fan_in, fan_out), jnp.float32, -bound, bound)
        b = jax.random.uniform(kb, (1, fan_out), jnp.float32, -bound, bound)
        return w, b

    k1, k2, k3 = jax.random.split(key, 3)
    w1, b1 = linear(k1, input_dims, HID1)
    w2, b2 = linear(k2, HID1, HID2)
    w3, b3 = linear(k3, HID2, output_dims)
    return {"w1": w1, "b1": b1, "w2": w2, "b2": b2, "w3": w3, "b3": b3}


if __name__ == "__main__":
    INPUT_DIMS = 32
    OUTPUT_DIMS = 16
    BATCH = 8

    key = jax.random.PRNGKey(0)
    k_x, k_p, k_g = jax.random.split(key, 3)

    x = jax.random.normal(k_x, (BATCH, INPUT_DIMS), jnp.float32)
    params = init_params(k_p, INPUT_DIMS, OUTPUT_DIMS)
    # Gumbel noise sampled as glue in plain JAX (the stochastic part of
    # F.gumbel_softmax); added to logits inside the kernel.
    gumbel_noise = jax.random.gumbel(k_g, (BATCH, OUTPUT_DIMS), jnp.float32)

    out = user_association_net_usl(x, params, gumbel_noise)
    out = jax.block_until_ready(out)

    # sanity: hard gumbel-softmax output must be one-hot rows over real classes
    assert out.shape == (BATCH, OUTPUT_DIMS)
    assert bool(jnp.all(jnp.sum(out, axis=-1) == 1.0))
    assert bool(jnp.all((out == 0.0) | (out == 1.0)))
    print("KERNEL_OK")
</pallas_src>

<mosaic_0001>
module attributes {stable_mosaic.version = 11 : i64} {
  func.func @uanet_kernel(%arg0: i32, %arg1: memref<8x128xbf16, #tpu.memory_space<vmem>>, %arg2: memref<128x128xbf16, #tpu.memory_space<vmem>>, %arg3: memref<1x128xf32, #tpu.memory_space<vmem>>, %arg4: memref<128x128xbf16, #tpu.memory_space<vmem>>, %arg5: memref<1x128xf32, #tpu.memory_space<vmem>>, %arg6: memref<128x128xbf16, #tpu.memory_space<vmem>>, %arg7: memref<1x128xf32, #tpu.memory_space<vmem>>, %arg8: memref<8x128xf32, #tpu.memory_space<vmem>>, %arg9: memref<8x128xf32, #tpu.memory_space<vmem>>) attributes {dimension_semantics = [#tpu.dimension_semantics<parallel>], iteration_bounds = array<i64: 1>, scalar_prefetch = 0 : i64, scratch_operands = 0 : i64, tpu.core_type = #tpu.core_type<tc>, window_params = [{transform_indices = @transform_0, window_bounds = array<i64: 8, 128>}, {pipeline_mode = #tpu.pipeline_mode<synchronous>, transform_indices = @transform_1, window_bounds = array<i64: 128, 128>}, {pipeline_mode = #tpu.pipeline_mode<synchronous>, transform_indices = @transform_2, window_bounds = array<i64: 1, 128>}, {pipeline_mode = #tpu.pipeline_mode<synchronous>, transform_indices = @transform_3, window_bounds = array<i64: 128, 128>}, {pipeline_mode = #tpu.pipeline_mode<synchronous>, transform_indices = @transform_4, window_bounds = array<i64: 1, 128>}, {pipeline_mode = #tpu.pipeline_mode<synchronous>, transform_indices = @transform_5, window_bounds = array<i64: 128, 128>}, {pipeline_mode = #tpu.pipeline_mode<synchronous>, transform_indices = @transform_6, window_bounds = array<i64: 1, 128>}, {transform_indices = @transform_7, window_bounds = array<i64: 8, 128>}, {transform_indices = @transform_8, window_bounds = array<i64: 8, 128>}]} {
    %c0 = arith.constant 0 : index
    %c0_0 = arith.constant 0 : index
    %0 = vector.load %arg1[%c0, %c0_0] : memref<8x128xbf16, #tpu.memory_space<vmem>>, vector<8x128xbf16>
    %c0_1 = arith.constant 0 : index
    %c0_2 = arith.constant 0 : index
    %1 = vector.load %arg2[%c0_1, %c0_2] : memref<128x128xbf16, #tpu.memory_space<vmem>>, vector<128x128xbf16>
    %cst = arith.constant dense<0.000000e+00> : vector<8x128xf32>
    %2 = tpu.matmul %0, %1, %cst {dimension_numbers = #tpu.dot_dimension_numbers<[1], [0], [0], [1], [0, 0, 1, 1], [], []>} : vector<8x128xbf16>, vector<128x128xbf16>, vector<8x128xf32> -> vector<8x128xf32>
    %c0_3 = arith.constant 0 : index
    %c0_4 = arith.constant 0 : index
    %3 = vector.load %arg3[%c0_3, %c0_4] : memref<1x128xf32, #tpu.memory_space<vmem>>, vector<1x128xf32>
    %4 = vector.broadcast %3 : vector<1x128xf32> to vector<8x128xf32>
    %5 = arith.addf %2, %4 : vector<8x128xf32>
    %cst_5 = arith.constant 0.000000e+00 : f32
    %6 = vector.broadcast %cst_5 : f32 to vector<8x128xf32>
    %7 = arith.cmpf ogt, %5, %6 : vector<8x128xf32>
    %8 = math.exp %5 : vector<8x128xf32>
    %cst_6 = arith.constant 1.000000e+00 : f32
    %9 = vector.broadcast %cst_6 : f32 to vector<8x128xf32>
    %10 = arith.subf %8, %9 : vector<8x128xf32>
    %11 = arith.select %7, %5, %10 : vector<8x128xi1>, vector<8x128xf32>
    %12 = arith.truncf %11 : vector<8x128xf32> to vector<8x128xbf16>
    %c0_7 = arith.constant 0 : index
    %c0_8 = arith.constant 0 : index
    %13 = vector.load %arg4[%c0_7, %c0_8] : memref<128x128xbf16, #tpu.memory_space<vmem>>, vector<128x128xbf16>
    %cst_9 = arith.constant dense<0.000000e+00> : vector<8x128xf32>
    %14 = tpu.matmul %12, %13, %cst_9 {dimension_numbers = #tpu.dot_dimension_numbers<[1], [0], [0], [1], [0, 0, 1, 1], [], []>} : vector<8x128xbf16>, vector<128x128xbf16>, vector<8x128xf32> -> vector<8x128xf32>
    %c0_10 = arith.constant 0 : index
    %c0_11 = arith.constant 0 : index
    %15 = vector.load %arg5[%c0_10, %c0_11] : memref<1x128xf32, #tpu.memory_space<vmem>>, vector<1x128xf32>
    %16 = vector.broadcast %15 : vector<1x128xf32> to vector<8x128xf32>
    %17 = arith.addf %14, %16 : vector<8x128xf32>
    %cst_12 = arith.constant 0.000000e+00 : f32
    %18 = vector.broadcast %cst_12 : f32 to vector<8x128xf32>
    %19 = arith.cmpf ogt, %17, %18 : vector<8x128xf32>
    %20 = math.exp %17 : vector<8x128xf32>
    %cst_13 = arith.constant 1.000000e+00 : f32
    %21 = vector.broadcast %cst_13 : f32 to vector<8x128xf32>
    %22 = arith.subf %20, %21 : vector<8x128xf32>
    %23 = arith.select %19, %17, %22 : vector<8x128xi1>, vector<8x128xf32>
    %24 = arith.truncf %23 : vector<8x128xf32> to vector<8x128xbf16>
    %c0_14 = arith.constant 0 : index
    %c0_15 = arith.constant 0 : index
    %25 = vector.load %arg6[%c0_14, %c0_15] : memref<128x128xbf16, #tpu.memory_space<vmem>>, vector<128x128xbf16>
    %cst_16 = arith.constant dense<0.000000e+00> : vector<8x128xf32>
    %26 = tpu.matmul %24, %25, %cst_16 {dimension_numbers = #tpu.dot_dimension_numbers<[1], [0], [0], [1], [0, 0, 1, 1], [], []>} : vector<8x128xbf16>, vector<128x128xbf16>, vector<8x128xf32> -> vector<8x128xf32>
    %c0_17 = arith.constant 0 : index
    %c0_18 = arith.constant 0 : index
    %27 = vector.load %arg7[%c0_17, %c0_18] : memref<1x128xf32, #tpu.memory_space<vmem>>, vector<1x128xf32>
    %28 = vector.broadcast %27 : vector<1x128xf32> to vector<8x128xf32>
    %29 = arith.addf %26, %28 : vector<8x128xf32>
    %c0_19 = arith.constant 0 : index
    %c0_20 = arith.constant 0 : index
    %30 = vector.load %arg8[%c0_19, %c0_20] : memref<8x128xf32, #tpu.memory_space<vmem>>, vector<8x128xf32>
    %31 = arith.addf %29, %30 : vector<8x128xf32>
    %32 = tpu.iota {dimensions = array<i32: 1>} : vector<8x128xi32>
    %cst_21 = arith.constant dense<0xFF800000> : vector<8xf32>
    %33 = vector.multi_reduction <maximumf>, %31, %cst_21 [1] : vector<8x128xf32> to vector<8xf32>
    %34 = vector.shape_cast %33 : vector<8xf32> to vector<8x1xf32>
    %35 = vector.broadcast %34 : vector<8x1xf32> to vector<8x128xf32>
    %36 = arith.cmpf oeq, %31, %35 : vector<8x128xf32>
    %c128_i32 = arith.constant 128 : i32
    %37 = vector.broadcast %c128_i32 : i32 to vector<8x128xi32>
    %38 = arith.select %36, %32, %37 : vector<8x128xi1>, vector<8x128xi32>
    %cst_22 = arith.constant dense<2147483647> : vector<8xi32>
    %39 = vector.multi_reduction <minsi>, %38, %cst_22 [1] : vector<8x128xi32> to vector<8xi32>
    %40 = vector.shape_cast %39 : vector<8xi32> to vector<8x1xi32>
    %41 = vector.broadcast %40 : vector<8x1xi32> to vector<8x128xi32>
    %42 = arith.cmpi eq, %32, %41 : vector<8x128xi32>
    %43 = arith.extui %42 : vector<8x128xi1> to vector<8x128xi32>
    %44 = arith.sitofp %43 : vector<8x128xi32> to vector<8x128xf32>
    %c0_23 = arith.constant 0 : index
    %c0_24 = arith.constant 0 : index
    %45 = vector.load %arg9[%c0_23, %c0_24] : memref<8x128xf32, #tpu.memory_space<vmem>>, vector<8x128xf32>
    tpu.vector_store %arg9[%c0_23, %c0_24], %44 {strides = array<i32>} : memref<8x128xf32, #tpu.memory_space<vmem>>, vector<8x128xf32>,
    return
  }
  func.func @transform_0(%arg0: i32) -> (i32, i32) {
    %c0_i32 = arith.constant 0 : i32
    %c0_i32_0 = arith.constant 0 : i32
    return %arg0, %c0_i32 : i32, i32
  }
  func.func @transform_1(%arg0: i32) -> (i32, i32) {
    %c0_i32 = arith.constant 0 : i32
    %c0_i32_0 = arith.constant 0 : i32
    %c0_i32_1 = arith.constant 0 : i32
    return %c0_i32, %c0_i32_0 : i32, i32
  }
  func.func @transform_2(%arg0: i32) -> (i32, i32) {
    %c0_i32 = arith.constant 0 : i32
    %c0_i32_0 = arith.constant 0 : i32
    %c0_i32_1 = arith.constant 0 : i32
    return %c0_i32, %c0_i32_0 : i32, i32
  }
  func.func @transform_3(%arg0: i32) -> (i32, i32) {
    %c0_i32 = arith.constant 0 : i32
    %c0_i32_0 = arith.constant 0 : i32
    %c0_i32_1 = arith.constant 0 : i32
    return %c0_i32, %c0_i32_0 : i32, i32
  }
  func.func @transform_4(%arg0: i32) -> (i32, i32) {
    %c0_i32 = arith.constant 0 : i32
    %c0_i32_0 = arith.constant 0 : i32
    %c0_i32_1 = arith.constant 0 : i32
    return %c0_i32, %c0_i32_0 : i32, i32
  }
  func.func @transform_5(%arg0: i32) -> (i32, i32) {
    %c0_i32 = arith.constant 0 : i32
    %c0_i32_0 = arith.constant 0 : i32
    %c0_i32_1 = arith.constant 0 : i32
    return %c0_i32, %c0_i32_0 : i32, i32
  }
  func.func @transform_6(%arg0: i32) -> (i32, i32) {
    %c0_i32 = arith.constant 0 : i32
    %c0_i32_0 = arith.constant 0 : i32
    %c0_i32_1 = arith.constant 0 : i32
    return %c0_i32, %c0_i32_0 : i32, i32
  }
  func.func @transform_7(%arg0: i32) -> (i32, i32) {
    %c0_i32 = arith.constant 0 : i32
    %c0_i32_0 = arith.constant 0 : i32
    return %arg0, %c0_i32 : i32, i32
  }
  func.func @transform_8(%arg0: i32) -> (i32, i32) {
    %c0_i32 = arith.constant 0 : i32
    %c0_i32_0 = arith.constant 0 : i32
    return %arg0, %c0_i32 : i32, i32
  }
}

</mosaic_0001>

<bundles_post_ra>
// kernel: user_association_net_usl.1
= control target key start
LH: loop header
LB: loop body
LE: loop exit
PB: predicated region body
PF: predicated region fallthrough
CT: control target
= control target key end

     0   :  { %v589_v1 = vmov 0.0   ;;  %vm590_vm0 = vmmov 0   ;;  %s767_s0 = inlined_call_operand.vmem [shape: bf16[8,128], index: 0, kind: input, shape index: {}]   ;;  %s768_s1 = inlined_call_operand.vmem [shape: bf16[128,128], index: 1, kind: input, shape index: {}]   ;;  %s769_s2 = inlined_call_operand.vmem [shape: f32[1,128], index: 2, kind: input, shape index: {}]   ;;  %s770_s3 = inlined_call_operand.vmem [shape: bf16[128,128], index: 3, kind: input, shape index: {}]   ;;  %s771_s4 = inlined_call_operand.vmem [shape: f32[1,128], index: 4, kind: input, shape index: {}]   ;;  %s772_s5 = inlined_call_operand.vmem [shape: bf16[128,128], index: 5, kind: input, shape index: {}]   ;;  %s773_s6 = inlined_call_operand.vmem [shape: f32[1,128], index: 6, kind: input, shape index: {}]   ;;  %s774_s7 = inlined_call_operand.vmem [shape: f32[8,128], index: 7, kind: input, shape index: {}]   ;;  %s775_s8 = inlined_call_operand.hbm [shape: f32[8,128], index: 8, kind: output, shape index: {}]  }
   0x1   :  { %v537_v0 = vld [vmem:[%s768_s1] sm:$0xff]   ;;  %474 = vmatprep.subr.bf16.mxu0 %v589_v1  ;;  %494 = vmatprep.subr.bf16.mxu1 %v589_v1  ;;  %v538_v2 = vld [vmem:[%s768_s1 + $0x8] sm:$0xff]   ;;  %v539_v3 = vld [vmem:[%s768_s1 + $0x10] sm:$0xff]  }
   0x2   :  { %475 = vmatpush3.bf16.msra.mxu0 %v537_v0  ;;  %490 = vmatprep.mubr.msk.bf16.mxu0 %vm590_vm0, %v589_v1  ;;  %v545_v4 = vld [vmem:[%s770_s3] sm:$0xff]   ;;  %v540_v5 = vld [vmem:[%s768_s1 + $0x18] sm:$0xff]   ;;  %v546_v6 = vld [vmem:[%s770_s3 + $0x8] sm:$0xff]  }
   0x3   :  { %476 = vmatprep.subr.bf16.mxu0 %v589_v1  ;;  %510 = vmatprep.mubr.msk.bf16.mxu1 %vm590_vm0, %v589_v1  ;;  %v541_v7 = vld [vmem:[%s768_s1 + $0x20] sm:$0xff]   ;;  %v547_v8 = vld [vmem:[%s770_s3 + $0x10] sm:$0xff]   ;;  %v542_v9 = vld [vmem:[%s768_s1 + $0x28] sm:$0xff]  }
   0x4   :  { %495 = vmatpush3.bf16.msra.mxu1 %v545_v4 }
   0x5   :  { %496 = vmatprep.subr.bf16.mxu1 %v589_v1 }
   0x6   :  { %477 = vmatpush3.bf16.msra.mxu0 %v538_v2 }
   0x7   :  { %478 = vmatprep.subr.bf16.mxu0 %v589_v1 }
   0x8   :  { %497 = vmatpush3.bf16.msra.mxu1 %v546_v6 }
   0x9   :  { %498 = vmatprep.subr.bf16.mxu1 %v589_v1 }
   0xa   :  { %479 = vmatpush3.bf16.msra.mxu0 %v539_v3 }
   0xb   :  { %480 = vmatprep.subr.bf16.mxu0 %v589_v1 }
   0xc   :  { %499 = vmatpush3.bf16.msra.mxu1 %v547_v8 }
   0xd   :  { %500 = vmatprep.subr.bf16.mxu1 %v589_v1 }
   0xe   :  { %481 = vmatpush3.bf16.msra.mxu0 %v540_v5 }
   0xf   :  { %482 = vmatprep.subr.bf16.mxu0 %v589_v1 }
  0x12   :  { %483 = vmatpush3.bf16.msra.mxu0 %v541_v7 }
  0x13   :  { %484 = vmatprep.subr.bf16.mxu0 %v589_v1 }
  0x14   :  { %13 = vsyncpa [#allocation3], 0  ;;  %v543_v10 = vld [vmem:[%s768_s1 + $0x30] sm:$0xff]   ;;  %v544_v11 = vld [vmem:[%s768_s1 + $0x38] sm:$0xff]   ;;  %v379_v56 = vlaneseq }
  0x15   :  { %v31_v12 = vld [vmem:[%s767_s0] sm:$0xf]  ;;  %v548_v13 = vld [vmem:[%s770_s3 + $0x18] sm:$0xff]   ;;  %v550_v15 = vld [vmem:[%s770_s3 + $0x28] sm:$0xff]  }
  0x16   :  { %485 = vmatpush3.bf16.msra.mxu0 %v542_v9  ;;  %501 = vmatpush3.bf16.msra.mxu1 %v548_v13  ;;  %v549_v14 = vld [vmem:[%s770_s3 + $0x20] sm:$0xff]   ;;  %v551_v16 = vld [vmem:[%s770_s3 + $0x30] sm:$0xff]   ;;  %v552_v17 = vld [vmem:[%s770_s3 + $0x38] sm:$0xff]   ;;  %v380_v57 = vand.u32 127, %v379_v56 }
  0x17   :  { %486 = vmatprep.subr.bf16.mxu0 %v589_v1  ;;  %502 = vmatprep.subr.bf16.mxu1 %v589_v1  ;;  %v553_v18 = vld [vmem:[%s772_s5] sm:$0xff]   ;;  %v554_v19 = vld [vmem:[%s772_s5 + $0x8] sm:$0xff]   ;;  %v555_v20 = vld [vmem:[%s772_s5 + $0x10] sm:$0xff]  }
  0x18   :  { %v417_v21 = vld [vmem:[%s769_s2] ss:$0 sm:$0xff]  ;;  %v556_v32 = vld [vmem:[%s772_s5 + $0x18] sm:$0xff]   ;;  %v558_v34 = vld [vmem:[%s772_s5 + $0x28] sm:$0xff]  }
  0x19   :  { %v557_v33 = vld [vmem:[%s772_s5 + $0x20] sm:$0xff]   ;;  %v559_v35 = vld [vmem:[%s772_s5 + $0x30] sm:$0xff]   ;;  %v560_v36 = vld [vmem:[%s772_s5 + $0x38] sm:$0xff]  }
  0x1a   :  { %487 = vmatpush3.bf16.msra.mxu0 %v543_v10  ;;  %503 = vmatpush3.bf16.msra.mxu1 %v549_v14  ;;  %v427_v37 = vld [vmem:[%s771_s4] ss:$0 sm:$0xff] }
  0x1b   :  { %488 = vmatprep.subr.bf16.mxu0 %v589_v1  ;;  %504 = vmatprep.subr.bf16.mxu1 %v589_v1  ;;  %v437_v48 = vld [vmem:[%s773_s6] ss:$0 sm:$0xff]  ;;  %s591_s6 = smov [#allocation2]  }
  0x1c   :  { %v377_v50 = vld [vmem:[%s774_s7] sm:$0xff]  ;;  %s409_s7 = sshll.u32 %s591_s6, 4  ;;  %s410_s7 = int_to_ptr.vmem [resolvable:$true] %s409_s7 }
  0x1d   :  { %s565_s11 = scalar_lea.vmem %s410_s7, 128  ;;  %p570_p1 = scmp.lt.s32.totalorder %s410_s7, %s410_s7 }
  0x1e   :  { %489 = vmatpush3.bf16.msra.mxu0 %v544_v11  ;;  %505 = vmatpush3.bf16.msra.mxu1 %v550_v15  ;;  %p566_p0 = scmp.ne.s32.totalorder %s410_s7, %s565_s11  ;;  %p571_p2 = scmp.lt.s32.totalorder %s565_s11, %s565_s11 }
  0x1f   :  { %514 = vmatprep.subr.bf16.mxu0 %v589_v1  ;;  %506 = vmatprep.subr.bf16.mxu1 %v589_v1 }
  0x20   :  { %p572_p3 = por %p571_p2, %p570_p1 }
  0x21   :  { %491 = vmatmul.mubr.bf16.vlgmr.msra.gmra.mrb[0].mxu0 %v31_v12 }
  0x22   :  { %530 = vmatprep.mubr.msk.bf16.mxu0 %vm590_vm0, %v589_v1  ;;  %507 = vmatpush3.bf16.msra.mxu1 %v551_v16  ;;  %p573_p4 = pnand %p572_p3, %p566_p0 }
  0x23   :  { %508 = vmatprep.subr.bf16.mxu1 %v589_v1  ;;  %515 = vmatpush3.bf16.msra.mxu0 %v553_v18 }
  0x24   :  { %516 = vmatprep.subr.bf16.mxu0 %v589_v1 }
  0x26   :  { %509 = vmatpush3.bf16.msra.mxu1 %v552_v17 }
  0x27   :  { %517 = vmatpush3.bf16.msra.mxu0 %v554_v19 }
  0x28   :  { %518 = vmatprep.subr.bf16.mxu0 %v589_v1 }
  0x2b   :  { %519 = vmatpush3.bf16.msra.mxu0 %v555_v20 }
  0x2c   :  { %520 = vmatprep.subr.bf16.mxu0 %v589_v1 }
  0x2f   :  { %521 = vmatpush3.bf16.msra.mxu0 %v556_v32 }
  0x30   :  { %522 = vmatprep.subr.bf16.mxu0 %v589_v1 }
  0x33   :  { %523 = vmatpush3.bf16.msra.mxu0 %v557_v33 }
  0x34   :  { %524 = vmatprep.subr.bf16.mxu0 %v589_v1 }
  0x37   :  { %525 = vmatpush3.bf16.msra.mxu0 %v558_v34 }
  0x38   :  { %526 = vmatprep.subr.bf16.mxu0 %v589_v1 }
  0x3b   :  { %527 = vmatpush3.bf16.msra.mxu0 %v559_v35 }
  0x3c   :  { %528 = vmatprep.subr.bf16.mxu0 %v589_v1 }
  0x3f   :  { %529 = vmatpush3.bf16.msra.mxu0 %v560_v36 }
  0xf4   :  { %v137_v22 = vpop.f32.mrb[0].mxu0 }
  0xf5   :  { %v138_v23 = vadd.f32 %v417_v21, %v137_v22  ;;  %v492_v24 = vpop.f32.mrb[1].mxu0 }
  0xf6   :  { %v140_v25 = vpop.f32.mrb[2].mxu0 }
  0xf7   :  { %v144_v26 = vmul.f32 1.442695, %v138_v23  ;;  %v493_v27 = vpop.f32.mrb[3].mxu0  ;;  %vm143_vm1 = vcmp.gt.f32.partialorder %v138_v23, 0.0 }
  0xf9   :  { %561 = vpow2.f32 %v144_v26 }
 0x103   :  { %v562_v28 = vpop.eup %561 }
 0x104   :  { %v426_v29 = vadd.f32 -1.0, %v562_v28 }
 0x106   :  { %v147_v30 = vsel %vm143_vm1, %v138_v23, %v426_v29 }
 0x107   :  { %v148_v31 = vpack.c.bf16 %v147_v30, %v147_v30 }
 0x109   :  { %511 = vmatmul.mubr.bf16.vlgmr.msra.gmra.mrb[0].mxu1 %v148_v31 }
 0x1dc   :  { %v254_v38 = vpop.f32.mrb[0].mxu1 }
 0x1dd   :  { %v255_v39 = vadd.f32 %v427_v37, %v254_v38  ;;  %v512_v40 = vpop.f32.mrb[1].mxu1 }
 0x1de   :  { %v257_v41 = vpop.f32.mrb[2].mxu1 }
 0x1df   :  { %v261_v42 = vmul.f32 1.442695, %v255_v39  ;;  %v513_v43 = vpop.f32.mrb[3].mxu1  ;;  %vm260_vm2 = vcmp.gt.f32.partialorder %v255_v39, 0.0 }
 0x1e1   :  { %563 = vpow2.f32 %v261_v42 }
 0x1eb   :  { %v564_v44 = vpop.eup %563 }
 0x1ec   :  { %v436_v45 = vadd.f32 -1.0, %v564_v44 }
 0x1ee   :  { %v264_v46 = vsel %vm260_vm2, %v255_v39, %v436_v45 }
 0x1ef   :  { %v265_v47 = vpack.c.bf16 %v264_v46, %v264_v46 }
 0x1f1   :  { %531 = vmatmul.mubr.bf16.vlgmr.msra.gmra.mrb[4].mxu0 %v265_v47 }
 0x2c4   :  { %v371_v49 = vpop.f32.mrb[4].mxu0 }
 0x2c5   :  { %v372_v51 = vadd.f32 %v437_v48, %v371_v49  ;;  %v532_v52 = vpop.f32.mrb[5].mxu0 }
 0x2c6   :  { %v374_v53 = vpop.f32.mrb[6].mxu0 }
 0x2c7   :  { %v533_v54 = vpop.f32.mrb[7].mxu0  ;;  %v378_v55 = vadd.f32 %v377_v50, %v372_v51 }
 0x2c9   :  { %381 = vmax.xlane.f32.xlu0 %v378_v55 }
 0x356   :  { %v382_v58 = vpop.xlane.xlu0 %381 }
 0x357   :  { %vm383_vm3 = vcmp.eq.f32.partialorder %v378_v55, %v382_v58 }
 0x358   :  { %v384_v59 = vsel %vm383_vm3, %v380_v57, 128 }
 0x359   :  { %v386_v60 = vshra.s32 %v384_v59, 16  ;;  %v385_v62 = vand.u32 65535, %v384_v59 }
 0x35b   :  { %v388_v61 = vcvt.s32.f32 %v386_v60  ;;  %v387_v0 = vcvt.s32.f32 %v385_v62 }
 0x35d   :  { %389 = vmin.xlane.f32.xlu0 %v388_v61 }
 0x3ea   :  { %v390_v63 = vpop.xlane.xlu0 %389 }
 0x3eb   :  { %vm391_vm4 = vcmp.eq.f32.partialorder %v388_v61, %v390_v63  ;;  %v396_v3 = vcvt.f32.s32 %v390_v63 }
 0x3ec   :  { %v392_v2 = vsel %vm391_vm4, %v387_v0, inf }
 0x3ed   :  { %393 = vmin.xlane.f32.xlu1 %v392_v2  ;;  %v397_v5 = vshll.u32 %v396_v3, 16 }
 0x47a   :  { %v394_v4 = vpop.xlane.xlu1 %393 }
 0x47b   :  { %v395_v6 = vcvt.f32.s32 %v394_v4 }
 0x47d   :  { %v398_v7 = vadd.s32 %v397_v5, %v395_v6 }
 0x47f   :  { %vm399_vm5 = vcmp.eq.s32.totalorder %v380_v57, %v398_v7 }
 0x480   :  { %v446_v8 = vsel %vm399_vm5, 1.0, %v589_v1 }
 0x481   :  { %402 = vst [vmem:[#allocation2] sm:$0xff] %v446_v8 }
 0x482   :  { %576 = shalt.err (!%p573_p4)
}
 0x483   :  { %s577_s14 = scalar_lea.hbm %s775_s8, 128 }
 0x484   :  { %p578_p5 = scmp.ne.s32.totalorder %s775_s8, %s577_s14  ;;  %p581_p6 = scmp.lt.u32.totalorder %s577_s14, %s775_s8 }
 0x486   :  { %p583_p7 = pnand %p581_p6, %p578_p5 }
 0x488   :  { %586 = shalt.err (!%p583_p7)
}
 0x489   :  { %412 = dma.vmem_to_hbm [thread:$0]  %s410_s7, 128, %s775_s8, [#allocation3]  }
 0x48a   :  { %587 = dma.done.wait [#allocation3], 128  }
 0x48b   :  { %588 = vsyncadd [#allocation3], 4294967168 }
 0x48c   :  { %416 = vsyncpa [#allocation3], 1 }

</bundles_post_ra>
